<compile_context>
chip_gen: v6e
topology: v6e:2x2x1
jax: 0.10.0
libtpu: 0.0.40
codegen_flags: <defaults>
</compile_context>

<pallas_src>
import functools

import jax
import jax.numpy as jnp
from jax.experimental import pallas as pl
from jax.experimental.pallas import tpu as pltpu


def _round_up(a, b):
    return (a + b - 1) // b * b


# ---------------------------------------------------------------------------
# Kernels
# ---------------------------------------------------------------------------

def _ffn_kernel_single(x_ref, w1_ref, b1_ref, w2_ref, b2_ref, o_ref, *, act_dtype):
    """hidden fits in a single tile: no accumulator, write output directly."""
    h = jnp.dot(x_ref[...], w1_ref[...], preferred_element_type=jnp.float32)
    h = jnp.tanh((h + b1_ref[...]).astype(act_dtype))
    # Dropout(p=0.0) == identity -> elided.
    o = jnp.dot(h.astype(w2_ref.dtype), w2_ref[...],
                preferred_element_type=jnp.float32)
    o_ref[...] = (o + b2_ref[...]).astype(o_ref.dtype)


def _ffn_kernel_acc(x_ref, w1_ref, b1_ref, w2_ref, b2_ref, o_ref, acc_ref, *,
                    act_dtype):
    """hidden is tiled: f32 VMEM accumulator resident across hidden tiles."""
    hblk = pl.program_id(1)

    h = jnp.dot(x_ref[...], w1_ref[...], preferred_element_type=jnp.float32)
    h = jnp.tanh((h + b1_ref[...]).astype(act_dtype))
    # Dropout(p=0.0) == identity -> elided.
    partial = jnp.dot(h.astype(w2_ref.dtype), w2_ref[...],
                      preferred_element_type=jnp.float32)

    # First hidden tile writes the accumulator (no zero-init pass), later add.
    @pl.when(hblk == 0)
    def _first():
        acc_ref[...] = partial

    @pl.when(hblk != 0)
    def _rest():
        acc_ref[...] += partial

    @pl.when(hblk == pl.num_programs(1) - 1)
    def _finalize():
        o_ref[...] = (acc_ref[...] + b2_ref[...]).astype(o_ref.dtype)


# ---------------------------------------------------------------------------
# Parameter prep (one-time, outside the hot path)
# ---------------------------------------------------------------------------

def prepare_ffn_params(w1, b1, w2, b2, *, param_dtype=jnp.bfloat16):
    """Transpose PyTorch (out,in) weights to (in,out), pad feature dims to
    multiples of 128 lanes, cast weights to the MXU dtype.  Biases stay f32."""
    hidden, dim = w1.shape
    dim_p = _round_up(dim, 128)
    hidden_p = _round_up(hidden, 128)

    def pad2d(a, rows, cols):
        return jnp.pad(a, ((0, rows - a.shape[0]), (0, cols - a.shape[1])))

    w1t = pad2d(w1.T.astype(param_dtype), dim_p, hidden_p)       # (dim_p, hidden_p)
    w2t = pad2d(w2.T.astype(param_dtype), hidden_p, dim_p)       # (hidden_p, dim_p)
    b1p = pad2d(b1.astype(jnp.float32).reshape(1, hidden), 1, hidden_p)
    b2p = pad2d(b2.astype(jnp.float32).reshape(1, dim), 1, dim_p)
    return w1t, b1p, w2t, b2p


# ---------------------------------------------------------------------------
# Tiling helpers
# ---------------------------------------------------------------------------

def _pick_hidden_tile(hidden_p, desired):
    th = max(128, min(desired, hidden_p) // 128 * 128)
    while hidden_p % th:
        th -= 128
    return th


def _vmem_bytes(tm, th, dim_p, x_bytes, w_bytes, o_bytes, multi_h):
    # Double-buffered pipeline buffers + resident f32 accumulator.
    est = 2 * (tm * dim_p * x_bytes        # x row tile
               + dim_p * th * w_bytes      # W1^T slice
               + th * 4                    # b1 slice (f32)
               + th * dim_p * w_bytes      # W2^T slice
               + dim_p * 4                 # b2 (f32)
               + tm * dim_p * o_bytes)     # output tile
    if multi_h:
        est += tm * dim_p * 4              # f32 accumulator scratch
    return est


def _vmem_capacity_bytes():
    try:
        return int(pltpu.get_tpu_info().vmem_capacity_bytes)
    except Exception:
        return 64 << 20   # conservative fallback (v7x per-core VMEM)


# ---------------------------------------------------------------------------
# Fused FFN forward
# ---------------------------------------------------------------------------

def feed_forward(x, w1t, b1p, w2t, b2p, *, tm=None, hidden_tile=512,
                 mxu_dtype=jnp.bfloat16, act_dtype=None):
    """x: [B, S, dim]; w1t/b1p/w2t/b2p from prepare_ffn_params."""
    B, S, dim = x.shape
    out_dtype = x.dtype
    M = B * S
    dim_p, hidden_p = w1t.shape
    assert w2t.shape == (hidden_p, dim_p)

    x_bytes = (jnp.dtype(mxu_dtype).itemsize if mxu_dtype is not None
               else jnp.dtype(x.dtype).itemsize)
    w_bytes = jnp.dtype(w1t.dtype).itemsize
    o_bytes = jnp.dtype(out_dtype).itemsize

    # ---- per-generation VMEM budget -----------------------------------
    vmem_physical = _vmem_capacity_bytes()
    vmem_budget = int(vmem_physical * 4 // 5)           # ~0.8x physical
    big_vmem = vmem_physical >= (100 << 20)              # 128 MiB chips vs 64 MiB

    # ---- row tile: arithmetic intensity ~ tm FLOP / weight byte --------
    if tm is None:
        tm = 1024 if big_vmem else 512
    tm = max(16, min(_round_up(M, 16), _round_up(tm, 16)))

    # Small-VMEM (64 MiB) chips have 2 TensorCores sharing the "parallel" M
    # axis: keep >= 2 row tiles so both cores get work (never below 256 rows).
    if not big_vmem and _round_up(M, 16) // tm < 2 and tm >= 512:
        tm = _round_up(tm // 2, 16)

    # ---- hidden tile: shrink th first to fit VMEM (weight traffic is
    # independent of th); only shrink tm as a last resort. ---------------
    th = _pick_hidden_tile(hidden_p, hidden_tile)
    while th > 128 and _vmem_bytes(tm, th, dim_p, x_bytes, w_bytes, o_bytes,
                                   hidden_p // th > 1) > vmem_budget:
        th = _pick_hidden_tile(hidden_p, th - 128)
    while tm > 256 and _vmem_bytes(tm, th, dim_p, x_bytes, w_bytes, o_bytes,
                                   hidden_p // th > 1) > vmem_budget:
        tm = max(256, _round_up(tm // 2, 16))
    # TODO(synk): for very large dim (dim_p >= 8192) a dim-contraction (K) tile
    # on the first matmul is needed to fit 64 MiB VMEM; not implemented here.

    M_p = _round_up(M, tm)
    row_tiles = M_p // tm
    hidden_tiles = hidden_p // th
    multi_h = hidden_tiles > 1

    # ---- prepare the activation (avoid redundant HBM passes) -----------
    x2d = x.reshape(M, dim)
    if mxu_dtype is not None and x2d.dtype != mxu_dtype:
        x2d = x2d.astype(mxu_dtype)
    padded = (M_p != M) or (dim_p != dim)
    if padded:
        x2d = jnp.pad(x2d, ((0, M_p - M), (0, dim_p - dim)))

    if act_dtype is None:
        # bias+tanh in bf16 when the MXU runs bf16 (native bf16 VPU/EUP on
        # v6e/v7x); pass act_dtype=jnp.float32 explicitly on v5e if desired.
        act_dtype = w1t.dtype if w1t.dtype == jnp.bfloat16 else jnp.float32

    # Weights are re-streamed once per row tile -> count that in HBM bytes.
    cost = pl.CostEstimate(
        flops=4 * M_p * dim_p * hidden_p,                # two matmuls
        transcendentals=M_p * hidden_p,                  # tanh
        bytes_accessed=(M_p * dim_p * x_bytes
                        + row_tiles * (w1t.size + w2t.size) * w_bytes
                        + row_tiles * (b1p.size + b2p.size) * 4
                        + M_p * dim_p * o_bytes),
    )

    if multi_h:
        kernel = functools.partial(_ffn_kernel_acc, act_dtype=act_dtype)
        scratch = [pltpu.VMEM((tm, dim_p), jnp.float32)]
    else:
        kernel = functools.partial(_ffn_kernel_single, act_dtype=act_dtype)
        scratch = []

    out = pl.pallas_call(
        kernel,
        out_shape=jax.ShapeDtypeStruct((M_p, dim_p), out_dtype),
        grid_spec=pltpu.PrefetchScalarGridSpec(
            num_scalar_prefetch=0,
            grid=(row_tiles, hidden_tiles),              # reduction axis last
            in_specs=[
                pl.BlockSpec((tm, dim_p), lambda i, h: (i, 0)),   # x row tile
                pl.BlockSpec((dim_p, th), lambda i, h: (0, h)),   # W1^T slice
                pl.BlockSpec((1, th),     lambda i, h: (0, h)),   # b1 slice
                pl.BlockSpec((th, dim_p), lambda i, h: (h, 0)),   # W2^T slice
                pl.BlockSpec((1, dim_p),  lambda i, h: (0, 0)),   # b2
            ],
            out_specs=pl.BlockSpec((tm, dim_p), lambda i, h: (i, 0)),
            scratch_shapes=scratch,
        ),
        compiler_params=pltpu.CompilerParams(
            dimension_semantics=("parallel", "arbitrary"),
            vmem_limit_bytes=vmem_budget,
        ),
        cost_estimate=cost,
    )(x2d, w1t, b1p, w2t, b2p)

    if padded:
        out = out[:M, :dim]
    return out.reshape(B, S, dim)


def feed_forward_ref(x, w1, b1, w2, b2):
    h = jnp.tanh(jnp.einsum("bsd,hd->bsh", x, w1) + b1)
    return jnp.einsum("bsh,dh->bsd", h, w2) + b2


if __name__ == "__main__":
    keys = jax.random.split(jax.random.PRNGKey(0), 12)

    def make_params(kw1, kb1, kw2, kb2, dim, hidden_dim):
        bound1 = 1.0 / (dim ** 0.5)
        w1 = jax.random.uniform(kw1, (hidden_dim, dim), jnp.float32, -bound1, bound1)
        b1 = jax.random.uniform(kb1, (hidden_dim,), jnp.float32, -bound1, bound1)
        bound2 = 1.0 / (hidden_dim ** 0.5)
        w2 = jax.random.uniform(kw2, (dim, hidden_dim), jnp.float32, -bound2, bound2)
        b2 = jax.random.uniform(kb2, (dim,), jnp.float32, -bound2, bound2)
        return w1, b1, w2, b2

    # ---- Case 1: module-default small shapes (single hidden tile path) ----
    B, S, dim, hidden_dim = 2, 8, 32, 64
    x = jax.random.normal(keys[0], (B, S, dim), dtype=jnp.float32)
    w1, b1, w2, b2 = make_params(keys[1], keys[2], keys[3], keys[4], dim, hidden_dim)
    ref = feed_forward_ref(x, w1, b1, w2, b2)

    # 1a) all-f32 path: validates kernel math tightly.
    p32 = prepare_ffn_params(w1, b1, w2, b2, param_dtype=jnp.float32)
    out32 = jax.block_until_ready(feed_forward(x, *p32, mxu_dtype=None))
    assert out32.shape == (B, S, dim)
    assert jnp.allclose(out32, ref, atol=1e-5, rtol=1e-5), "f32 mismatch vs reference"

    # 1b) bf16-MXU path (production default).
    pbf = prepare_ffn_params(w1, b1, w2, b2, param_dtype=jnp.bfloat16)
    outbf = jax.block_until_ready(feed_forward(x, *pbf, mxu_dtype=jnp.bfloat16))
    assert outbf.shape == (B, S, dim)
    assert jnp.allclose(outbf, ref, atol=5e-2, rtol=5e-2), "bf16 mismatch vs reference"

    # ---- Case 2: forces the multi-hidden-tile accumulator path and >1 row tile ----
    B2, S2, dim2, hidden2 = 2, 24, 32, 256
    x2 = jax.random.normal(keys[5], (B2, S2, dim2), dtype=jnp.float32)
    w1b, b1b, w2b, b2b = make_params(keys[6], keys[7], keys[8], keys[9], dim2, hidden2)
    ref2 = feed_forward_ref(x2, w1b, b1b, w2b, b2b)

    p32b = prepare_ffn_params(w1b, b1b, w2b, b2b, param_dtype=jnp.float32)
    out2 = jax.block_until_ready(
        feed_forward(x2, *p32b, mxu_dtype=None, tm=16, hidden_tile=128))
    assert out2.shape == (B2, S2, dim2)
    assert jnp.allclose(out2, ref2, atol=1e-5, rtol=1e-5), "multi-tile mismatch vs reference"

    # TODO(synk): Dropout with p > 0 (training mode) would need pltpu.prng_*; the
    # module's default p=0.0 / eval mode is the identity and is elided here.
    print("KERNEL_OK")
</pallas_src>

<mosaic_0001>
module attributes {stable_mosaic.version = 11 : i64} {
  func.func @_ffn_kernel_single(%arg0: i32, %arg1: i32, %arg2: memref<16x128xf32, #tpu.memory_space<vmem>>, %arg3: memref<128x128xf32, #tpu.memory_space<vmem>>, %arg4: memref<1x128xf32, #tpu.memory_space<vmem>>, %arg5: memref<128x128xf32, #tpu.memory_space<vmem>>, %arg6: memref<1x128xf32, #tpu.memory_space<vmem>>, %arg7: memref<16x128xf32, #tpu.memory_space<vmem>>) attributes {dimension_semantics = [#tpu.dimension_semantics<parallel>, #tpu.dimension_semantics<arbitrary>], iteration_bounds = array<i64: 1, 1>, scalar_prefetch = 0 : i64, scratch_operands = 0 : i64, tpu.core_type = #tpu.core_type<tc>, window_params = [{transform_indices = @transform_0, window_bounds = array<i64: 16, 128>}, {transform_indices = @transform_1, window_bounds = array<i64: 128, 128>}, {transform_indices = @transform_2, window_bounds = array<i64: 1, 128>}, {transform_indices = @transform_3, window_bounds = array<i64: 128, 128>}, {pipeline_mode = #tpu.pipeline_mode<synchronous>, transform_indices = @transform_4, window_bounds = array<i64: 1, 128>}, {transform_indices = @transform_5, window_bounds = array<i64: 16, 128>}]} {
    %c0 = arith.constant 0 : index
    %c0_0 = arith.constant 0 : index
    %0 = vector.load %arg2[%c0, %c0_0] : memref<16x128xf32, #tpu.memory_space<vmem>>, vector<16x128xf32>
    %c0_1 = arith.constant 0 : index
    %c0_2 = arith.constant 0 : index
    %1 = vector.load %arg3[%c0_1, %c0_2] : memref<128x128xf32, #tpu.memory_space<vmem>>, vector<128x128xf32>
    %cst = arith.constant dense<0.000000e+00> : vector<16x128xf32>
    %2 = tpu.matmul %0, %1, %cst {dimension_numbers = #tpu.dot_dimension_numbers<[1], [0], [0], [1], [0, 0, 1, 1], [], []>} : vector<16x128xf32>, vector<128x128xf32>, vector<16x128xf32> -> vector<16x128xf32>
    %c0_3 = arith.constant 0 : index
    %c0_4 = arith.constant 0 : index
    %3 = vector.load %arg4[%c0_3, %c0_4] : memref<1x128xf32, #tpu.memory_space<vmem>>, vector<1x128xf32>
    %4 = vector.broadcast %3 : vector<1x128xf32> to vector<16x128xf32>
    %5 = arith.addf %2, %4 : vector<16x128xf32>
    %6 = math.tanh %5 : vector<16x128xf32>
    %c0_5 = arith.constant 0 : index
    %c0_6 = arith.constant 0 : index
    %7 = vector.load %arg5[%c0_5, %c0_6] : memref<128x128xf32, #tpu.memory_space<vmem>>, vector<128x128xf32>
    %cst_7 = arith.constant dense<0.000000e+00> : vector<16x128xf32>
    %8 = tpu.matmul %6, %7, %cst_7 {dimension_numbers = #tpu.dot_dimension_numbers<[1], [0], [0], [1], [0, 0, 1, 1], [], []>} : vector<16x128xf32>, vector<128x128xf32>, vector<16x128xf32> -> vector<16x128xf32>
    %c0_8 = arith.constant 0 : index
    %c0_9 = arith.constant 0 : index
    %9 = vector.load %arg6[%c0_8, %c0_9] : memref<1x128xf32, #tpu.memory_space<vmem>>, vector<1x128xf32>
    %10 = vector.broadcast %9 : vector<1x128xf32> to vector<16x128xf32>
    %11 = arith.addf %8, %10 : vector<16x128xf32>
    %c0_10 = arith.constant 0 : index
    %c0_11 = arith.constant 0 : index
    %12 = vector.load %arg7[%c0_10, %c0_11] : memref<16x128xf32, #tpu.memory_space<vmem>>, vector<16x128xf32>
    tpu.vector_store %arg7[%c0_10, %c0_11], %11 {strides = array<i32>} : memref<16x128xf32, #tpu.memory_space<vmem>>, vector<16x128xf32>,
    return
  }
  func.func @transform_0(%arg0: i32, %arg1: i32) -> (i32, i32) {
    %c0_i32 = arith.constant 0 : i32
    %c0_i32_0 = arith.constant 0 : i32
    return %arg0, %c0_i32 : i32, i32
  }
  func.func @transform_1(%arg0: i32, %arg1: i32) -> (i32, i32) {
    %c0_i32 = arith.constant 0 : i32
    %c0_i32_0 = arith.constant 0 : i32
    return %c0_i32, %arg1 : i32, i32
  }
  func.func @transform_2(%arg0: i32, %arg1: i32) -> (i32, i32) {
    %c0_i32 = arith.constant 0 : i32
    %c0_i32_0 = arith.constant 0 : i32
    return %c0_i32, %arg1 : i32, i32
  }
  func.func @transform_3(%arg0: i32, %arg1: i32) -> (i32, i32) {
    %c0_i32 = arith.constant 0 : i32
    %c0_i32_0 = arith.constant 0 : i32
    return %arg1, %c0_i32 : i32, i32
  }
  func.func @transform_4(%arg0: i32, %arg1: i32) -> (i32, i32) {
    %c0_i32 = arith.constant 0 : i32
    %c0_i32_0 = arith.constant 0 : i32
    %c0_i32_1 = arith.constant 0 : i32
    return %c0_i32, %c0_i32_0 : i32, i32
  }
  func.func @transform_5(%arg0: i32, %arg1: i32) -> (i32, i32) {
    %c0_i32 = arith.constant 0 : i32
    %c0_i32_0 = arith.constant 0 : i32
    return %arg0, %c0_i32 : i32, i32
  }
}

</mosaic_0001>

<bundles_post_ra>
// kernel: tpu_custom_call.1
= control target key start
LH: loop header
LB: loop body
LE: loop exit
PB: predicated region body
PF: predicated region fallthrough
CT: control target
= control target key end

     0   :  { %10 = vsyncpa [#allocation3], 0  ;;  %s552_s0 = inlined_call_operand.hbm [shape: f32[16,128], index: 0, kind: input, shape index: {}]   ;;  %s553_s1 = inlined_call_operand.hbm [shape: f32[128,128], index: 1, kind: input, shape index: {}]   ;;  %s554_s2 = inlined_call_operand.vmem [shape: f32[1,128], index: 2, kind: input, shape index: {}]   ;;  %s555_s3 = inlined_call_operand.hbm [shape: f32[128,128], index: 3, kind: input, shape index: {}]   ;;  %s556_s4 = inlined_call_operand.vmem [shape: f32[1,128], index: 4, kind: input, shape index: {}]   ;;  %s557_s5 = inlined_call_operand.hbm [shape: f32[16,128], index: 5, kind: output, shape index: {}]  }
   0x1   :  { %11 = vsyncpa [#allocation6], 0 }
   0x2   :  { %12 = vsyncpa [#allocation4], 0  ;;  %s486_s18 = smov [#allocation5]   ;;  %s487_s20 = smov [#allocation2]  }
   0x3   :  { %s30_s19 = sshll.u32 %s486_s18, 4  ;;  %s18_s21 = sshll.u32 %s487_s20, 4  ;;  %s31_s19 = int_to_ptr.vmem [resolvable:$true] %s30_s19  ;;  %s19_s21 = int_to_ptr.vmem [resolvable:$true] %s18_s21 }
   0x4   :  { %s408_s22 = scalar_lea.vmem %s31_s19, 2048  ;;  %p413_p1 = scmp.lt.s32.totalorder %s31_s19, %s31_s19 }
   0x5   :  { %p409_p0 = scmp.ne.s32.totalorder %s31_s19, %s408_s22  ;;  %p414_p2 = scmp.lt.s32.totalorder %s408_s22, %s408_s22 }
   0x7   :  { %p415_p3 = por %p414_p2, %p413_p1 }
   0x9   :  { %p416_p4 = pnand %p415_p3, %p409_p0 }
   0xb   :  { %419 = shalt.err (!%p416_p4)
}
   0xc   :  { %s488_s23 = smov 128   ;;  %s489_s24 = smov 8  }
   0xd   :  { %36 = dma.hbm_to_vmem [thread:$0]  %s553_s1, 2048, %s31_s19, [#allocation6], %s488_s23, %s488_s23, %s489_s24  }
   0xe   :  { %s428_s27 = scalar_lea.vmem %s19_s21, 256  ;;  %p433_p6 = scmp.lt.s32.totalorder %s19_s21, %s19_s21 }
   0xf   :  { %p429_p5 = scmp.ne.s32.totalorder %s19_s21, %s428_s27  ;;  %p434_p7 = scmp.lt.s32.totalorder %s428_s27, %s428_s27 }
  0x11   :  { %p435_p8 = por %p434_p7, %p433_p6 }
  0x13   :  { %p436_p9 = pnand %p435_p8, %p429_p5 }
  0x15   :  { %439 = shalt.err (!%p436_p9)
}
  0x16   :  { %24 = dma.hbm_to_vmem [thread:$0]  %s552_s0, 256, %s19_s21, [#allocation3], %s488_s23, %s488_s23, %s489_s24  }
  0x17   :  { %s490_s30 = smov [#allocation7]  }
  0x18   :  { %s44_s6 = sshll.u32 %s490_s30, 4  ;;  %s45_s6 = int_to_ptr.vmem [resolvable:$true] %s44_s6 }
  0x19   :  { %s448_s7 = scalar_lea.vmem %s45_s6, 2048  ;;  %p453_p11 = scmp.lt.s32.totalorder %s45_s6, %s45_s6 }
  0x1a   :  { %p449_p10 = scmp.ne.s32.totalorder %s45_s6, %s448_s7  ;;  %p454_p12 = scmp.lt.s32.totalorder %s448_s7, %s448_s7 }
  0x1c   :  { %p455_p13 = por %p454_p12, %p453_p11 }
  0x1e   :  { %p456_p0 = pnand %p455_p13, %p449_p10 }
  0x20   :  { %459 = shalt.err (!%p456_p0)
}
  0x21   :  { %50 = dma.hbm_to_vmem [thread:$0]  %s555_s3, 2048, %s45_s6, [#allocation6], %s488_s23, %s488_s23, %s489_s24  }
  0x22   :  { %480 = dma.done.wait [#allocation3], 256  }
  0x23   :  { %481 = vsyncadd [#allocation3], 4294967040 }
  0x24   :  { %482 = dma.done.wait [#allocation6], 4096  }
  0x25   :  { %483 = vsyncadd [#allocation6], 4294963200  ;;  %v79_v0 = vld [vmem:[#allocation5 + $0x78] sm:$0xff]  ;;  %v78_v1 = vld [vmem:[#allocation5 + $0x70] sm:$0xff]  ;;  %s491_s11 = smov [#allocation8]  }
  0x26   :  { %320 = vmatprep.subr.mxu0 %v79_v0  ;;  %v77_v2 = vld [vmem:[#allocation5 + $0x68] sm:$0xff]  ;;  %v76_v3 = vld [vmem:[#allocation5 + $0x60] sm:$0xff]  ;;  %v62_v4 = vld [vmem:[#allocation2] sm:$0xff]  ;;  %s269_s12 = sshll.u32 %s491_s11, 4  ;;  %s270_s12 = int_to_ptr.vmem [resolvable:$true] %s269_s12 }
  0x27   :  { %321 = vmatpush3.msra.mxu0 %v79_v0  ;;  %v75_v5 = vld [vmem:[#allocation5 + $0x58] sm:$0xff]  ;;  %352 = vmatprep.mubr.f32.mxu0 %v62_v4  ;;  %v178_v7 = vld [vmem:[#allocation7 + $0x70] sm:$0xff]  ;;  %v177_v9 = vld [vmem:[#allocation7 + $0x68] sm:$0xff]  ;;  %p465_p2 = scmp.lt.s32.totalorder %s270_s12, %s270_s12 }
  0x28   :  { %322 = vmatprep.subr.mxu0 %v78_v1  ;;  %v179_v6 = vld [vmem:[#allocation7 + $0x78] sm:$0xff]  ;;  %v74_v8 = vld [vmem:[#allocation5 + $0x50] sm:$0xff]  ;;  %v73_v10 = vld [vmem:[#allocation5 + $0x48] sm:$0xff] }
  0x29   :  { %323 = vmatpush3.msra.mxu0 %v78_v1  ;;  %355 = vmatprep.subr.mxu1 %v179_v6  ;;  %v176_v11 = vld [vmem:[#allocation7 + $0x60] sm:$0xff]  ;;  %v175_v13 = vld [vmem:[#allocation7 + $0x58] sm:$0xff]  ;;  %v174_v15 = vld [vmem:[#allocation7 + $0x50] sm:$0xff] }
  0x2a   :  { %324 = vmatprep.subr.mxu0 %v77_v2  ;;  %356 = vmatpush3.msra.mxu1 %v179_v6  ;;  %v72_v12 = vld [vmem:[#allocation5 + $0x40] sm:$0xff]  ;;  %v71_v14 = vld [vmem:[#allocation5 + $0x38] sm:$0xff]  ;;  %v70_v16 = vld [vmem:[#allocation5 + $0x30] sm:$0xff] }
  0x2b   :  { %325 = vmatpush3.msra.mxu0 %v77_v2  ;;  %357 = vmatprep.subr.mxu1 %v178_v7  ;;  %v69_v17 = vld [vmem:[#allocation5 + $0x28] sm:$0xff]  ;;  %v68_v18 = vld [vmem:[#allocation5 + $0x20] sm:$0xff]  ;;  %v67_v19 = vld [vmem:[#allocation5 + $0x18] sm:$0xff] }
  0x2c   :  { %326 = vmatprep.subr.mxu0 %v76_v3  ;;  %358 = vmatpush3.msra.mxu1 %v178_v7  ;;  %v66_v20 = vld [vmem:[#allocation5 + $0x10] sm:$0xff]  ;;  %v65_v21 = vld [vmem:[#allocation5 + $0x8] sm:$0xff]  ;;  %v64_v22 = vld [vmem:[#allocation5] sm:$0xff] }
  0x2d   :  { %327 = vmatpush3.msra.mxu0 %v76_v3  ;;  %359 = vmatprep.subr.mxu1 %v177_v9  ;;  %v63_v23 = vld [vmem:[#allocation2 + $0x8] sm:$0xff]  ;;  %v173_v24 = vld [vmem:[#allocation7 + $0x48] sm:$0xff]  ;;  %v172_v25 = vld [vmem:[#allocation7 + $0x40] sm:$0xff] }
  0x2e   :  { %328 = vmatprep.subr.mxu0 %v75_v5  ;;  %360 = vmatpush3.msra.mxu1 %v177_v9  ;;  %v171_v26 = vld [vmem:[#allocation7 + $0x38] sm:$0xff]  ;;  %v170_v27 = vld [vmem:[#allocation7 + $0x30] sm:$0xff]  ;;  %v169_v28 = vld [vmem:[#allocation7 + $0x28] sm:$0xff] }
  0x2f   :  { %329 = vmatpush3.msra.mxu0 %v75_v5  ;;  %361 = vmatprep.subr.mxu1 %v176_v11  ;;  %v168_v29 = vld [vmem:[#allocation7 + $0x20] sm:$0xff]  ;;  %v167_v30 = vld [vmem:[#allocation7 + $0x18] sm:$0xff]  ;;  %v166_v31 = vld [vmem:[#allocation7 + $0x10] sm:$0xff] }
  0x30   :  { %330 = vmatprep.subr.mxu0 %v74_v8  ;;  %362 = vmatpush3.msra.mxu1 %v176_v11  ;;  %v165_v32 = vld [vmem:[#allocation7 + $0x8] sm:$0xff]  ;;  %v164_v33 = vld [vmem:[#allocation7] sm:$0xff]  ;;  %v282_v34 = vld [vmem:[%s554_s2] ss:$0 sm:$0xff]  ;;  %s460_s2 = scalar_lea.vmem %s270_s12, 256 }
  0x31   :  { %331 = vmatpush3.msra.mxu0 %v74_v8  ;;  %363 = vmatprep.subr.mxu1 %v175_v13  ;;  %v283_v41 = vld [vmem:[%s556_s4] ss:$0 sm:$0xff]  ;;  %p461_p1 = scmp.ne.s32.totalorder %s270_s12, %s460_s2  ;;  %p466_p3 = scmp.lt.s32.totalorder %s460_s2, %s460_s2 }
  0x32   :  { %332 = vmatprep.subr.mxu0 %v73_v10  ;;  %364 = vmatpush3.msra.mxu1 %v175_v13 }
  0x33   :  { %333 = vmatpush3.msra.mxu0 %v73_v10  ;;  %365 = vmatprep.subr.mxu1 %v174_v15  ;;  %p467_p4 = por %p466_p3, %p465_p2 }
  0x34   :  { %334 = vmatprep.subr.mxu0 %v72_v12  ;;  %366 = vmatpush3.msra.mxu1 %v174_v15 }
  0x35   :  { %335 = vmatpush3.msra.mxu0 %v72_v12  ;;  %367 = vmatprep.subr.mxu1 %v173_v24  ;;  %p468_p5 = pnand %p467_p4, %p461_p1 }
  0x36   :  { %336 = vmatprep.subr.mxu0 %v71_v14  ;;  %368 = vmatpush3.msra.mxu1 %v173_v24 }
  0x37   :  { %337 = vmatpush3.msra.mxu0 %v71_v14  ;;  %369 = vmatprep.subr.mxu1 %v172_v25 }
  0x38   :  { %338 = vmatprep.subr.mxu0 %v70_v16  ;;  %370 = vmatpush3.msra.mxu1 %v172_v25 }
  0x39   :  { %339 = vmatpush3.msra.mxu0 %v70_v16  ;;  %371 = vmatprep.subr.mxu1 %v171_v26 }
  0x3a   :  { %340 = vmatprep.subr.mxu0 %v69_v17  ;;  %372 = vmatpush3.msra.mxu1 %v171_v26 }
  0x3b   :  { %341 = vmatpush3.msra.mxu0 %v69_v17  ;;  %373 = vmatprep.subr.mxu1 %v170_v27 }
  0x3c   :  { %342 = vmatprep.subr.mxu0 %v68_v18  ;;  %374 = vmatpush3.msra.mxu1 %v170_v27 }
  0x3d   :  { %343 = vmatpush3.msra.mxu0 %v68_v18  ;;  %375 = vmatprep.subr.mxu1 %v169_v28 }
  0x3e   :  { %344 = vmatprep.subr.mxu0 %v67_v19  ;;  %376 = vmatpush3.msra.mxu1 %v169_v28 }
  0x3f   :  { %345 = vmatpush3.msra.mxu0 %v67_v19  ;;  %377 = vmatprep.subr.mxu1 %v168_v29 }
  0x40   :  { %346 = vmatprep.subr.mxu0 %v66_v20  ;;  %378 = vmatpush3.msra.mxu1 %v168_v29 }
  0x41   :  { %347 = vmatpush3.msra.mxu0 %v66_v20  ;;  %379 = vmatprep.subr.mxu1 %v167_v30 }
  0x42   :  { %348 = vmatprep.subr.mxu0 %v65_v21  ;;  %380 = vmatpush3.msra.mxu1 %v167_v30 }
  0x43   :  { %349 = vmatpush3.msra.mxu0 %v65_v21  ;;  %381 = vmatprep.subr.mxu1 %v166_v31 }
  0x44   :  { %350 = vmatprep.subr.mxu0 %v64_v22  ;;  %382 = vmatpush3.msra.mxu1 %v166_v31 }
  0x45   :  { %351 = vmatpush3.msra.mxu0 %v64_v22  ;;  %383 = vmatprep.subr.mxu1 %v165_v32 }
  0x46   :  { %353 = vmatmul.mubr.f32.vlgmr.msra.gmra.mxu0 %v63_v23  ;;  %384 = vmatpush3.msra.mxu1 %v165_v32 }
  0x47   :  { %385 = vmatprep.subr.mxu1 %v164_v33 }
  0x48   :  { %386 = vmatpush3.msra.mxu1 %v164_v33 }
 0x106   :  { %v354_v35 = vpop.f32.mrf.mxu0 }
 0x107   :  { %v159_v36 = vadd.f32 %v354_v35, %v282_v34 }
 0x108   :  { %v153_v37 = vpop.f32.mrf.mxu0 }
 0x109   :  { %v154_v38 = vadd.f32 %v282_v34, %v153_v37 }
 0x10b   :  { %396 = vtanh.f32 %v154_v38 }
 0x10c   :  { %398 = vtanh.f32 %v159_v36 }
 0x118   :  { %v397_v39 = vpop.eup %396 }
 0x119   :  { %v399_v40 = vpop.eup %398  ;;  %387 = vmatprep.mubr.f32.mxu1 %v397_v39 }
 0x11a   :  { %388 = vmatmul.mubr.f32.vlgmr.msra.gmra.mxu1 %v399_v40 }
 0x1da   :  { %v389_v42 = vpop.f32.mrf.mxu1 }
 0x1db   :  { %v259_v43 = vadd.f32 %v389_v42, %v283_v41 }
 0x1dc   :  { %v253_v44 = vpop.f32.mrf.mxu1 }
 0x1dd   :  { %263 = vst [vmem:[#allocation8 + $0x8] sm:$0xff] %v259_v43  ;;  %v254_v45 = vadd.f32 %v283_v41, %v253_v44 }
 0x1df   :  { %262 = vst [vmem:[#allocation8] sm:$0xff] %v254_v45 }
 0x1e0   :  { %471 = shalt.err (!%p468_p5)
}
 0x1e1   :  { %275 = dma.vmem_to_hbm [thread:$0]  %s270_s12, 256, %s557_s5, [#allocation4], %s488_s23, %s488_s23, %s489_s24  }
 0x1e2   :  { %484 = dma.done.wait [#allocation4], 256  }
 0x1e3   :  { %485 = vsyncadd [#allocation4], 4294967040 }
 0x1e4   :  { %279 = vsyncpa [#allocation3], 1 }
 0x1e5   :  { %280 = vsyncpa [#allocation6], 1 }
 0x1e6   :  { %281 = vsyncpa [#allocation4], 1 }

</bundles_post_ra>
